<compile_context>
chip_gen: v6e
topology: v6e:2x2x1
jax: 0.10.0
libtpu: 0.0.40
codegen_flags: <defaults>
</compile_context>

<pallas_src>
import functools

import jax
import jax.numpy as jnp
from jax.experimental import pallas as pl
from jax.experimental.pallas import tpu as pltpu

LANES = 128            # TPU lane width (last vreg dim)
SUBLANES = 8           # TPU sublane width (second-to-last vreg dim, f32)
BLOCK_ROWS = 2048      # rows per tile for the tiled path (1 MiB f32 blocks)
FUSED_ROWS = 8192      # single fused-kernel path up to 8192x128 (~4 MiB f32)
NCORES = 2             # parallel split of pass 1 (uses both TCs on v7x)


def _mask_tail(ex, base_flat_idx, n_valid):
    """Zero elements whose flat index is >= n_valid (tail pad / OOB rows).

    Note: flat indices are computed in int32, so this assumes numel < 2**31.
    jnp.where is a select, so exp() of padded garbage (inf/NaN) never leaks.
    """
    rows, lanes = ex.shape
    row = jax.lax.broadcasted_iota(jnp.int32, (rows, lanes), 0)
    lane = jax.lax.broadcasted_iota(jnp.int32, (rows, lanes), 1)
    flat = base_flat_idx + row * lanes + lane
    return jnp.where(flat < n_valid, ex, 0.0)


# ---------------------------------------------------------------------------
# Small-input path: whole slab in one VMEM tile, fused exp + sum + scale.
# ---------------------------------------------------------------------------
def _fused_softmax_kernel(x_ref, o_ref, *, n_valid, needs_mask):
    ex = jnp.exp(x_ref[...].astype(jnp.float32))        # EUP transcendental
    if needs_mask:                                       # static python branch
        ex = _mask_tail(ex, 0, n_valid)
    inv = 1.0 / jnp.sum(ex)                              # one exact reciprocal
    o_ref[...] = (ex * inv).astype(o_ref.dtype)          # cheap VALU multiply


# ---------------------------------------------------------------------------
# Tiled path, pass 1: sum-only. Per-core (8,128) partial-sum accumulator.
# ---------------------------------------------------------------------------
def _partial_sum_kernel(x_ref, sum_ref, *, n_valid, blocks_per_core):
    c = pl.program_id(0)          # parallel (core) axis
    j = pl.program_id(1)          # sequential reduction axis

    @pl.when(j == 0)
    def _():
        sum_ref[...] = jnp.zeros_like(sum_ref)

    block_rows = x_ref.shape[0]
    ex = jnp.exp(x_ref[...].astype(jnp.float32))
    # Mask everything past the valid flat range; also zeroes whole blocks whose
    # logical index was clamped in the index_map (base >= n_valid).
    base = (c * blocks_per_core + j) * (block_rows * LANES)
    ex = _mask_tail(ex, base, n_valid)
    # Per-(sublane, lane) partial sums: pure VALU adds over the leading dim,
    # no cross-lane/cross-sublane XLU work in the inner loop.  The reshape
    # (block_rows,128)->(block_rows/8,8,128) preserves the native (8,128) tile.
    part = jnp.sum(ex.reshape(-1, SUBLANES, LANES), axis=0)
    sum_ref[...] += part


# ---------------------------------------------------------------------------
# Tiled path, pass 2: recompute exp(x) and scale by 1/sum (single reduce here).
# ---------------------------------------------------------------------------
def _scale_kernel(x_ref, sums_ref, o_ref):
    total = jnp.sum(sums_ref[...])                       # (2*8,128) -> scalar
    inv = 1.0 / total                                    # exact, once per block
    ex = jnp.exp(x_ref[...].astype(jnp.float32))
    o_ref[...] = (ex * inv).astype(o_ref.dtype)


def softmax_global(x: jax.Array) -> jax.Array:
    """exp(x) / sum(exp(x)) over ALL elements (matches the PyTorch module)."""
    orig_shape = x.shape
    orig_dtype = x.dtype
    is_float = jnp.issubdtype(orig_dtype, jnp.floating)
    out_dtype = orig_dtype if is_float else jnp.float32

    n = int(x.size)
    if n == 0:
        return jnp.zeros(orig_shape, out_dtype)

    xf = x.reshape(-1)
    if not is_float:
        xf = xf.astype(jnp.float32)

    rows = -(-n // LANES)                 # ceil-div: rows of the 128-lane slab
    pad = rows * LANES - n
    if pad:
        # Minimal (<128 element) tail pad so the flat vector reshapes to
        # (rows, 128); padded slots are masked in-kernel (flat index >= n).
        xf = jnp.pad(xf, (0, pad))
    x2d = xf.reshape(rows, LANES)

    if rows <= FUSED_ROWS:
        # Single fused kernel: whole slab resident in VMEM (1 read + 1 write).
        out2d = pl.pallas_call(
            functools.partial(_fused_softmax_kernel,
                              n_valid=n, needs_mask=pad > 0),
            out_shape=jax.ShapeDtypeStruct((rows, LANES), out_dtype),
            grid=(1,),
            in_specs=[pl.BlockSpec((rows, LANES), lambda i: (0, 0))],
            out_specs=pl.BlockSpec((rows, LANES), lambda i: (0, 0)),
            compiler_params=pltpu.CompilerParams(
                dimension_semantics=("arbitrary",),
                vmem_limit_bytes=32 * 1024 * 1024),
        )(x2d)
    else:
        num_blocks = pl.cdiv(rows, BLOCK_ROWS)
        bpc = pl.cdiv(num_blocks, NCORES)      # blocks per (logical) core

        def x_map_pass1(c, j):
            # Clamp out-of-range logical blocks (only happens for the padded
            # steps of the last core); their contribution is zeroed in-kernel.
            idx = c * bpc + j
            return (jnp.minimum(idx, num_blocks - 1), 0)

        # Pass 1: global-sum accumulation only (no exp slab written to HBM).
        sums = pl.pallas_call(
            functools.partial(_partial_sum_kernel,
                              n_valid=n, blocks_per_core=bpc),
            out_shape=jax.ShapeDtypeStruct((NCORES * SUBLANES, LANES),
                                           jnp.float32),
            grid=(NCORES, bpc),
            in_specs=[pl.BlockSpec((BLOCK_ROWS, LANES), x_map_pass1)],
            out_specs=pl.BlockSpec((SUBLANES, LANES), lambda c, j: (c, 0)),
            compiler_params=pltpu.CompilerParams(
                dimension_semantics=("parallel", "arbitrary")),
        )(x2d)

        # Pass 2: recompute exp(x) and scale by 1/total; parallel axis is
        # megacore-sharded automatically on v7x.
        out2d = pl.pallas_call(
            _scale_kernel,
            out_shape=jax.ShapeDtypeStruct((rows, LANES), out_dtype),
            grid=(num_blocks,),
            in_specs=[
                pl.BlockSpec((BLOCK_ROWS, LANES), lambda i: (i, 0)),
                pl.BlockSpec((NCORES * SUBLANES, LANES), lambda i: (0, 0)),
            ],
            out_specs=pl.BlockSpec((BLOCK_ROWS, LANES), lambda i: (i, 0)),
            compiler_params=pltpu.CompilerParams(
                dimension_semantics=("parallel",)),
        )(x2d, sums)

    out = out2d.reshape(-1)
    if pad:
        out = out[:n]
    return out.reshape(orig_shape)


if __name__ == "__main__":
    key = jax.random.PRNGKey(0)

    # Primary small input consistent with a generic NCHW forward pass
    # (fused single-tile path).
    x = jax.random.normal(key, (2, 4, 16, 16), dtype=jnp.float32)
    y = softmax_global(x)
    jax.block_until_ready(y)

    ref = jnp.exp(x) / jnp.sum(jnp.exp(x))
    assert y.shape == x.shape and y.dtype == x.dtype
    assert jnp.allclose(y, ref, rtol=1e-5, atol=1e-6)
    assert jnp.allclose(jnp.sum(y), 1.0, atol=1e-5)

    k1, k2, k3 = jax.random.split(key, 3)

    # Ragged size (not a multiple of 128) -> minimal tail pad + in-kernel mask.
    xr = jax.random.normal(k1, (3, 5, 7, 11), dtype=jnp.float32)
    yr = softmax_global(xr)
    assert jnp.allclose(yr, jnp.exp(xr) / jnp.sum(jnp.exp(xr)),
                        rtol=1e-5, atol=1e-7)

    # Tiled two-pass path, block count not divisible by NCORES (exercises the
    # clamped / fully-masked core-split blocks); rows divide BLOCK_ROWS evenly.
    xt = jax.random.normal(k2, (2, 5, 1024, 128), dtype=jnp.float32)
    yt = softmax_global(xt)
    assert jnp.allclose(yt, jnp.exp(xt) / jnp.sum(jnp.exp(xt)),
                        rtol=2e-5, atol=1e-10)

    # Tiled path with a partially out-of-bounds last block (8640 rows).
    xp = jax.random.normal(k3, (4, 3, 720, 128), dtype=jnp.float32)
    yp = softmax_global(xp)
    assert jnp.allclose(yp, jnp.exp(xp) / jnp.sum(jnp.exp(xp)),
                        rtol=2e-5, atol=1e-10)

    jax.block_until_ready((y, yr, yt, yp))
    print("KERNEL_OK")
</pallas_src>

<mosaic_0001>
module attributes {stable_mosaic.version = 11 : i64} {
  func.func @_fused_softmax_kernel(%arg0: i32, %arg1: memref<16x128xf32, #tpu.memory_space<vmem>>, %arg2: memref<16x128xf32, #tpu.memory_space<vmem>>) attributes {dimension_semantics = [#tpu.dimension_semantics<arbitrary>], iteration_bounds = array<i64: 1>, scalar_prefetch = 0 : i64, scratch_operands = 0 : i64, tpu.core_type = #tpu.core_type<tc>, window_params = [{pipeline_mode = #tpu.pipeline_mode<synchronous>, transform_indices = @transform_0, window_bounds = array<i64: 16, 128>}, {pipeline_mode = #tpu.pipeline_mode<synchronous>, transform_indices = @transform_1, window_bounds = array<i64: 16, 128>}]} {
    %c0 = arith.constant 0 : index
    %c0_0 = arith.constant 0 : index
    %0 = vector.load %arg1[%c0, %c0_0] : memref<16x128xf32, #tpu.memory_space<vmem>>, vector<16x128xf32>
    %1 = math.exp %0 : vector<16x128xf32>
    %2 = vector.shape_cast %1 : vector<16x128xf32> to vector<1x16x128xf32>
    %cst = arith.constant dense<0.000000e+00> : vector<1xf32>
    %3 = vector.multi_reduction <add>, %2, %cst [1, 2] : vector<1x16x128xf32> to vector<1xf32>
    %4 = vector.shape_cast %3 : vector<1xf32> to vector<1x1x1xf32>
    %5 = vector.extract %4[0, 0, 0] : f32 from vector<1x1x1xf32>
    %cst_1 = arith.constant 1.000000e+00 : f32
    %6 = arith.divf %cst_1, %5 : f32
    %7 = vector.broadcast %6 : f32 to vector<16x128xf32>
    %8 = arith.mulf %1, %7 : vector<16x128xf32>
    %c0_2 = arith.constant 0 : index
    %c0_3 = arith.constant 0 : index
    %9 = vector.load %arg2[%c0_2, %c0_3] : memref<16x128xf32, #tpu.memory_space<vmem>>, vector<16x128xf32>
    tpu.vector_store %arg2[%c0_2, %c0_3], %8 {strides = array<i32>} : memref<16x128xf32, #tpu.memory_space<vmem>>, vector<16x128xf32>,
    return
  }
  func.func @transform_0(%arg0: i32) -> (i32, i32) {
    %c0_i32 = arith.constant 0 : i32
    %c0_i32_0 = arith.constant 0 : i32
    %c0_i32_1 = arith.constant 0 : i32
    return %c0_i32, %c0_i32_0 : i32, i32
  }
  func.func @transform_1(%arg0: i32) -> (i32, i32) {
    %c0_i32 = arith.constant 0 : i32
    %c0_i32_0 = arith.constant 0 : i32
    %c0_i32_1 = arith.constant 0 : i32
    return %c0_i32, %c0_i32_0 : i32, i32
  }
}

</mosaic_0001>

<bundles_post_ra>
// kernel: tpu_custom_call.1
= control target key start
LH: loop header
LB: loop body
LE: loop exit
PB: predicated region body
PF: predicated region fallthrough
CT: control target
= control target key end

     0   :  { %6 = vsyncpa [#allocation3], 0  ;;  %s148_s0 = inlined_call_operand.hbm [shape: f32[16,128], index: 0, kind: input, shape index: {}]   ;;  %s149_s1 = inlined_call_operand.hbm [shape: f32[16,128], index: 1, kind: output, shape index: {}]  }
   0x1   :  { %7 = vsyncpa [#allocation4], 0  ;;  %s122_s6 = smov [#allocation2]  }
   0x2   :  { %s13_s7 = sshll.u32 %s122_s6, 4  ;;  %s14_s7 = int_to_ptr.vmem [resolvable:$true] %s13_s7 }
   0x3   :  { %s86_s8 = scalar_lea.vmem %s14_s7, 256  ;;  %p91_p1 = scmp.lt.s32.totalorder %s14_s7, %s14_s7 }
   0x4   :  { %p87_p0 = scmp.ne.s32.totalorder %s14_s7, %s86_s8  ;;  %p92_p2 = scmp.lt.s32.totalorder %s86_s8, %s86_s8 }
   0x6   :  { %p93_p3 = por %p92_p2, %p91_p1 }
   0x8   :  { %p94_p4 = pnand %p93_p3, %p87_p0 }
   0xa   :  { %97 = shalt.err (!%p94_p4)
}
   0xb   :  { %s123_s9 = smov 128   ;;  %s124_s10 = smov 8  }
   0xc   :  { %19 = dma.hbm_to_vmem [thread:$0]  %s148_s0, 256, %s14_s7, [#allocation3], %s123_s9, %s123_s9, %s124_s10  }
   0xd   :  { %118 = dma.done.wait [#allocation3], 256  }
   0xe   :  { %119 = vsyncadd [#allocation3], 4294967040  ;;  %v23_v0 = vld [vmem:[#allocation2] sm:$0xff]  ;;  %v24_v1 = vld [vmem:[#allocation2 + $0x8] sm:$0xff]  ;;  %s125_s13 = smov [#allocation5]  }
   0xf   :  { %v25_v2 = vmul.f32 1.442695, %v23_v0  ;;  %v27_v3 = vmul.f32 1.442695, %v24_v1  ;;  %s52_s14 = sshll.u32 %s125_s13, 4  ;;  %s53_s14 = int_to_ptr.vmem [resolvable:$true] %s52_s14 }
  0x10   :  { %s98_s16 = scalar_lea.vmem %s53_s14, 256  ;;  %p103_p6 = scmp.lt.s32.totalorder %s53_s14, %s53_s14 }
  0x11   :  { %72 = vpow2.f32 %v25_v2  ;;  %p99_p5 = scmp.ne.s32.totalorder %s53_s14, %s98_s16  ;;  %p104_p7 = scmp.lt.s32.totalorder %s98_s16, %s98_s16 }
  0x12   :  { %74 = vpow2.f32 %v27_v3 }
  0x13   :  { %p105_p8 = por %p104_p7, %p103_p6 }
  0x15   :  { %p106_p9 = pnand %p105_p8, %p99_p5 }
  0x1e   :  { %v73_v4 = vpop.eup %72 }
  0x1f   :  { %v75_v5 = vpop.eup %74 }
  0x20   :  { %v29_v6 = vadd.f32 %v75_v5, %v73_v4 }
  0x22   :  { %30 = vadd.xlane.f32.xlu0 %v29_v6 }
  0xab   :  { %v31_v7 = vpop.xlane.xlu0 %30 }
  0xac   :  { %v32_v8 = vrot.slane %v31_v7, 4 }
  0xae   :  { %v33_v9 = vadd.f32 %v32_v8, %v31_v7 }
  0xb0   :  { %v34_v10 = vrot.slane %v33_v9, 2 }
  0xb2   :  { %v35_v11 = vadd.f32 %v34_v10, %v33_v9 }
  0xb4   :  { %v36_v12 = vrot.slane %v35_v11, 1 }
  0xb6   :  { %v37_v13 = vadd.f32 %v36_v12, %v35_v11 }
  0xb8   :  { %64 = vpush %v37_v13 }
  0xe9   :  { %s65_s0 = spop %64 }
  0xea   :  { %v39_v14 = vstv %s65_s0 }
  0xeb   :  { %76 = vrcp.f32 %v39_v14 }
  0xf8   :  { %v77_v15 = vpop.eup %76 }
  0xf9   :  { %66 = vpush %v77_v15 }
 0x12a   :  { %s67_s15 = spop %66 }
 0x12b   :  { %v42_v16 = vstv %s67_s15 }
 0x12c   :  { %v43_v17 = vmul.f32 %v73_v4, %v42_v16  ;;  %v44_v18 = vmul.f32 %v75_v5, %v42_v16 }
 0x12e   :  { %45 = vst [vmem:[#allocation5] sm:$0xff] %v43_v17  ;;  %46 = vst [vmem:[#allocation5 + $0x8] sm:$0xff] %v44_v18 }
 0x12f   :  { %109 = shalt.err (!%p106_p9)
}
 0x130   :  { %58 = dma.vmem_to_hbm [thread:$0]  %s53_s14, 256, %s149_s1, [#allocation4], %s123_s9, %s123_s9, %s124_s10  }
 0x131   :  { %120 = dma.done.wait [#allocation4], 256  }
 0x132   :  { %121 = vsyncadd [#allocation4], 4294967040 }
 0x133   :  { %62 = vsyncpa [#allocation3], 1 }
 0x134   :  { %63 = vsyncpa [#allocation4], 1 }

</bundles_post_ra>
